<compile_context>
chip_gen: v5e
topology: v5e:2x2
jax: 0.10.0
libtpu: 0.0.40
codegen_flags: <defaults>
</compile_context>

<pallas_src>
import functools
import math

import jax
import jax.numpy as jnp
from jax.experimental import pallas as pl
from jax.experimental.pallas import tpu as pltpu


# ---------------------------------------------------------------------------
# Kernel
# ---------------------------------------------------------------------------
def _gated_attention_kernel(x_ref, wvu_ref, bvu_ref, ws_ref, bs_ref, out_ref,
                            *, hidden_dim, reduce_out):
    # Fused value/gate projection: [tile, D] @ [D, 2H] -> [tile, 2H].
    # Operands are fed to the MXU in their native dtype; accumulate in f32.
    x = x_ref[...]
    z = jnp.dot(x, wvu_ref[...], preferred_element_type=jnp.float32)
    z = z + bvu_ref[...].astype(jnp.float32)

    # feature_transform: Linear -> Tanh   (Dropout = identity at inference)
    v = jnp.tanh(z[:, :hidden_dim])
    # attention_gate: Linear -> Sigmoid, as 0.5*(1+tanh(0.5*z)) -> one EUP push.
    u = 0.5 * (1.0 + jnp.tanh(0.5 * z[:, hidden_dim:]))
    gated = v * u  # [tile, H], f32
    # TODO(synk): training-mode Dropout(p=0.25) masking (pltpu.prng_*) is not
    # implemented; inference semantics (identity) are reproduced.

    if reduce_out:
        # num_classes == 1: a matmul would use 1/128 of the MXU output width;
        # a VPU multiply + lane reduce on the otherwise-idle XLU is cheaper.
        ws_row = ws_ref[...].astype(jnp.float32)            # [1, H]
        attn = jnp.sum(gated * ws_row, axis=-1, keepdims=True)
        attn = attn + bs_ref[...].astype(jnp.float32)        # [tile, 1]
    else:
        attn = jnp.dot(gated.astype(ws_ref.dtype), ws_ref[...],
                       preferred_element_type=jnp.float32)
        attn = attn + bs_ref[...].astype(jnp.float32)

    out_ref[...] = attn.astype(out_ref.dtype)


# ---------------------------------------------------------------------------
# Parameter fusion (done ONCE, not per forward call)
# ---------------------------------------------------------------------------
def fuse_params(wv, bv, wu, bu, ws, bs):
    """Pre-fuse Wv|Wu and bv|bu (single MXU matmul) and pre-transpose the scorer
    weight for the num_classes == 1 reduce path. Call once at init time."""
    num_classes = ws.shape[1]
    return dict(
        w_vu=jnp.concatenate([wv, wu], axis=1),          # [D, 2H]
        b_vu=jnp.concatenate([bv, bu], axis=1),          # [1, 2H]
        ws=(ws.T if num_classes == 1 else ws),           # (1, H) or (H, C)
        bs=bs,                                           # (1, C)
        hidden_dim=wv.shape[1],
        num_classes=num_classes,
    )


# ---------------------------------------------------------------------------
# Tiling helpers
# ---------------------------------------------------------------------------
def _vmem_capacity_bytes():
    try:
        return int(pltpu.get_tpu_info().vmem_capacity_bytes)
    except Exception:
        return 64 * 1024 * 1024  # v7x-safe fallback


def _round_up(x, m):
    return ((x + m - 1) // m) * m


def _padded_nbytes(shape, itemsize):
    """Approximate VMEM footprint of a block (sublane/lane padded)."""
    if len(shape) == 1:
        return _round_up(shape[0], 128) * itemsize
    lead = math.prod(shape[:-2]) if len(shape) > 2 else 1
    return lead * _round_up(shape[-2], 8) * _round_up(shape[-1], 128) * itemsize


def _pick_row_tile(N, D, C, itemsize, weight_vmem_bytes, vmem_capacity,
                   target_tile_bytes):
    # Dtype-aware sublane packing multiple (f32: 8, bf16: 16, 8-bit: 32).
    sub = {4: 8, 2: 16, 1: 32}.get(itemsize, 8)

    # 1) Amortize the ~0.35us per-grid-step overhead: target a few MiB of
    #    feature rows per step.
    tile = max(sub, (target_tile_bytes // max(D * itemsize, 1)) // sub * sub)

    # 2) Per-generation VMEM budget: double-buffered x tile + double-buffered
    #    (lane-padded) out tile + double-buffered weights must stay well under
    #    capacity (64 MiB on v7x vs 128 MiB on v5e/v6e).
    budget = int(0.65 * vmem_capacity) - weight_vmem_bytes
    per_row = 2 * itemsize * (_round_up(D, 128) + _round_up(C, 128))
    if budget > per_row * sub:
        tile = min(tile, (budget // per_row) // sub * sub)
    else:
        tile = sub
        # TODO(synk): for very large D the right scaling path is a K-reduction
        # grid axis over D with an f32 VMEM accumulator, not a tiny row tile.

    # 3) Guarantee >= 2 grid steps when there is enough work, so
    #    dimension_semantics=("parallel",) can shard across both v7x TensorCores.
    if N >= 2 * sub:
        half = _round_up(-(-N // 2), sub)
        tile = min(tile, half)

    if tile >= N:
        tile = N  # single block == full array dims (always a legal block shape)
    return tile


# ---------------------------------------------------------------------------
# Forward
# ---------------------------------------------------------------------------
def gated_attention(features, params, *, target_tile_bytes=2 * 1024 * 1024):
    """features: [N, D]; params from fuse_params. Returns (attn [N, C], features)."""
    N, D = features.shape
    H = params["hidden_dim"]
    C = params["num_classes"]
    w_vu, b_vu, ws, bs = params["w_vu"], params["b_vu"], params["ws"], params["bs"]
    reduce_out = (C == 1)

    itemsize = features.dtype.itemsize
    vmem_capacity = _vmem_capacity_bytes()
    # Grid-invariant operands are conservatively assumed double-buffered.
    weight_vmem = 2 * sum(_padded_nbytes(a.shape, a.dtype.itemsize)
                          for a in (w_vu, b_vu, ws, bs))
    tile = _pick_row_tile(N, D, C, itemsize, weight_vmem, vmem_capacity,
                          target_tile_bytes)
    # Ragged last block is handled by Pallas (reads clipped, OOB writes dropped):
    # no jnp.pad copy of features, no output slice.
    grid = (pl.cdiv(N, tile),)

    kernel = functools.partial(_gated_attention_kernel,
                               hidden_dim=H, reduce_out=reduce_out)

    cost = pl.CostEstimate(
        flops=int(2 * N * D * (2 * H) + 2 * N * H * C + 6 * N * H),
        transcendentals=int(2 * N * H),
        bytes_accessed=int(features.size * itemsize
                           + N * C * itemsize
                           + sum(a.size * a.dtype.itemsize
                                 for a in (w_vu, b_vu, ws, bs))),
    )

    attn = pl.pallas_call(
        kernel,
        out_shape=jax.ShapeDtypeStruct((N, C), features.dtype),
        grid=grid,
        in_specs=[
            pl.BlockSpec((tile, D), lambda i: (i, 0)),     # feature row tile
            pl.BlockSpec(w_vu.shape, lambda i: (0, 0)),    # fused Wv|Wu (invariant)
            pl.BlockSpec(b_vu.shape, lambda i: (0, 0)),    # fused bv|bu (invariant)
            pl.BlockSpec(ws.shape, lambda i: (0, 0)),      # Ws row (C==1) / matrix
            pl.BlockSpec(bs.shape, lambda i: (0, 0)),      # bs
        ],
        out_specs=pl.BlockSpec((tile, C), lambda i: (i, 0)),
        compiler_params=pltpu.CompilerParams(
            dimension_semantics=("parallel",),
            vmem_limit_bytes=int(0.75 * vmem_capacity),
        ),
        cost_estimate=cost,
    )(features, w_vu, b_vu, ws, bs)

    return attn, features


# ---------------------------------------------------------------------------
# Deterministic synthetic parameters (PyTorch Linear shapes, pre-transposed)
# ---------------------------------------------------------------------------
def init_params(key, input_dim, hidden_dim, num_classes, dtype=jnp.float32):
    k = jax.random.split(key, 6)
    s_in = 1.0 / jnp.sqrt(input_dim)
    s_h = 1.0 / jnp.sqrt(hidden_dim)
    wv = jax.random.uniform(k[0], (input_dim, hidden_dim), dtype, -s_in, s_in)
    bv = jax.random.uniform(k[1], (1, hidden_dim), dtype, -s_in, s_in)
    wu = jax.random.uniform(k[2], (input_dim, hidden_dim), dtype, -s_in, s_in)
    bu = jax.random.uniform(k[3], (1, hidden_dim), dtype, -s_in, s_in)
    ws = jax.random.uniform(k[4], (hidden_dim, num_classes), dtype, -s_h, s_h)
    bs = jax.random.uniform(k[5], (1, num_classes), dtype, -s_h, s_h)
    return wv, bv, wu, bu, ws, bs


if __name__ == "__main__":
    key = jax.random.PRNGKey(0)

    def reference(features, wv, bv, wu, bu, ws, bs):
        v = jnp.tanh(features @ wv + bv)
        u = jax.nn.sigmoid(features @ wu + bu)
        return (v * u) @ ws + bs

    configs = [
        # (N, input_dim, hidden_dim, num_classes)
        (50, 64, 32, 1),   # default MIL head (C==1): reduce path + ragged grid
        (16, 32, 16, 3),   # multi-class scorer path (MXU matmul for the head)
    ]
    for idx, (N, D, H, C) in enumerate(configs):
        kx, kp, key = jax.random.split(key, 3)
        features = jax.random.normal(kx, (N, D), jnp.float32)
        raw = init_params(kp, D, H, C)
        fused = fuse_params(*raw)   # hoisted: fuse once, not per forward call

        attn, feats_out = gated_attention(features, fused)
        jax.block_until_ready((attn, feats_out))

        attn_ref = reference(features, *raw)
        assert attn.shape == (N, C)
        assert jnp.allclose(attn, attn_ref, atol=1e-5, rtol=1e-5), (
            f"config {idx}: max err {jnp.max(jnp.abs(attn - attn_ref))}")
        assert jnp.array_equal(feats_out, features)

    print("KERNEL_OK")
</pallas_src>

<mosaic_0001>
module attributes {stable_mosaic.version = 11 : i64} {
  func.func @_gated_attention_kernel(%arg0: i32, %arg1: memref<32x64xf32, #tpu.memory_space<vmem>>, %arg2: memref<64x64xf32, #tpu.memory_space<vmem>>, %arg3: memref<1x64xf32, #tpu.memory_space<vmem>>, %arg4: memref<1x32xf32, #tpu.memory_space<vmem>>, %arg5: memref<1x1xf32, #tpu.memory_space<vmem>>, %arg6: memref<32x1xf32, #tpu.memory_space<vmem>>) attributes {dimension_semantics = [#tpu.dimension_semantics<parallel>], iteration_bounds = array<i64: 2>, scalar_prefetch = 0 : i64, scratch_operands = 0 : i64, tpu.core_type = #tpu.core_type<tc>, window_params = [{transform_indices = @transform_0, window_bounds = array<i64: 32, 64>}, {pipeline_mode = #tpu.pipeline_mode<synchronous>, transform_indices = @transform_1, window_bounds = array<i64: 64, 64>}, {pipeline_mode = #tpu.pipeline_mode<synchronous>, transform_indices = @transform_2, window_bounds = array<i64: 1, 64>}, {pipeline_mode = #tpu.pipeline_mode<synchronous>, transform_indices = @transform_3, window_bounds = array<i64: 1, 32>}, {pipeline_mode = #tpu.pipeline_mode<synchronous>, transform_indices = @transform_4, window_bounds = array<i64: 1, 1>}, {transform_indices = @transform_5, window_bounds = array<i64: 32, 1>}]} {
    %c0 = arith.constant 0 : index
    %c0_0 = arith.constant 0 : index
    %0 = vector.load %arg1[%c0, %c0_0] : memref<32x64xf32, #tpu.memory_space<vmem>>, vector<32x64xf32>
    %c0_1 = arith.constant 0 : index
    %c0_2 = arith.constant 0 : index
    %1 = vector.load %arg2[%c0_1, %c0_2] : memref<64x64xf32, #tpu.memory_space<vmem>>, vector<64x64xf32>
    %cst = arith.constant dense<0.000000e+00> : vector<32x64xf32>
    %2 = tpu.matmul %0, %1, %cst {dimension_numbers = #tpu.dot_dimension_numbers<[1], [0], [0], [1], [0, 0, 1, 1], [], []>} : vector<32x64xf32>, vector<64x64xf32>, vector<32x64xf32> -> vector<32x64xf32>
    %c0_3 = arith.constant 0 : index
    %c0_4 = arith.constant 0 : index
    %3 = vector.load %arg3[%c0_3, %c0_4] : memref<1x64xf32, #tpu.memory_space<vmem>>, vector<1x64xf32>
    %4 = vector.broadcast %3 : vector<1x64xf32> to vector<32x64xf32>
    %5 = arith.addf %2, %4 : vector<32x64xf32>
    %6 = vector.extract_strided_slice %5 {offsets = [0, 0], sizes = [32, 32], strides = [1, 1]} : vector<32x64xf32> to vector<32x32xf32>
    %7 = math.tanh %6 : vector<32x32xf32>
    %8 = vector.extract_strided_slice %5 {offsets = [0, 32], sizes = [32, 32], strides = [1, 1]} : vector<32x64xf32> to vector<32x32xf32>
    %cst_5 = arith.constant 5.000000e-01 : f32
    %9 = vector.broadcast %cst_5 : f32 to vector<32x32xf32>
    %10 = arith.mulf %9, %8 : vector<32x32xf32>
    %11 = math.tanh %10 : vector<32x32xf32>
    %cst_6 = arith.constant 1.000000e+00 : f32
    %12 = vector.broadcast %cst_6 : f32 to vector<32x32xf32>
    %13 = arith.addf %12, %11 : vector<32x32xf32>
    %cst_7 = arith.constant 5.000000e-01 : f32
    %14 = vector.broadcast %cst_7 : f32 to vector<32x32xf32>
    %15 = arith.mulf %14, %13 : vector<32x32xf32>
    %16 = arith.mulf %7, %15 : vector<32x32xf32>
    %c0_8 = arith.constant 0 : index
    %c0_9 = arith.constant 0 : index
    %17 = vector.load %arg4[%c0_8, %c0_9] : memref<1x32xf32, #tpu.memory_space<vmem>>, vector<1x32xf32>
    %18 = vector.broadcast %17 : vector<1x32xf32> to vector<32x32xf32>
    %19 = arith.mulf %16, %18 : vector<32x32xf32>
    %cst_10 = arith.constant dense<0.000000e+00> : vector<32xf32>
    %20 = vector.multi_reduction <add>, %19, %cst_10 [1] : vector<32x32xf32> to vector<32xf32>
    %21 = vector.shape_cast %20 : vector<32xf32> to vector<32x1xf32>
    %c0_11 = arith.constant 0 : index
    %c0_12 = arith.constant 0 : index
    %22 = vector.load %arg5[%c0_11, %c0_12] : memref<1x1xf32, #tpu.memory_space<vmem>>, vector<1x1xf32>
    %23 = vector.broadcast %22 : vector<1x1xf32> to vector<32x1xf32>
    %24 = arith.addf %21, %23 : vector<32x1xf32>
    %c0_13 = arith.constant 0 : index
    %c0_14 = arith.constant 0 : index
    %25 = vector.load %arg6[%c0_13, %c0_14] : memref<32x1xf32, #tpu.memory_space<vmem>>, vector<32x1xf32>
    tpu.vector_store %arg6[%c0_13, %c0_14], %24 {strides = array<i32>} : memref<32x1xf32, #tpu.memory_space<vmem>>, vector<32x1xf32>,
    return
  }
  func.func @transform_0(%arg0: i32) -> (i32, i32) {
    %c0_i32 = arith.constant 0 : i32
    %c0_i32_0 = arith.constant 0 : i32
    return %arg0, %c0_i32 : i32, i32
  }
  func.func @transform_1(%arg0: i32) -> (i32, i32) {
    %c0_i32 = arith.constant 0 : i32
    %c0_i32_0 = arith.constant 0 : i32
    %c0_i32_1 = arith.constant 0 : i32
    return %c0_i32, %c0_i32_0 : i32, i32
  }
  func.func @transform_2(%arg0: i32) -> (i32, i32) {
    %c0_i32 = arith.constant 0 : i32
    %c0_i32_0 = arith.constant 0 : i32
    %c0_i32_1 = arith.constant 0 : i32
    return %c0_i32, %c0_i32_0 : i32, i32
  }
  func.func @transform_3(%arg0: i32) -> (i32, i32) {
    %c0_i32 = arith.constant 0 : i32
    %c0_i32_0 = arith.constant 0 : i32
    %c0_i32_1 = arith.constant 0 : i32
    return %c0_i32, %c0_i32_0 : i32, i32
  }
  func.func @transform_4(%arg0: i32) -> (i32, i32) {
    %c0_i32 = arith.constant 0 : i32
    %c0_i32_0 = arith.constant 0 : i32
    %c0_i32_1 = arith.constant 0 : i32
    return %c0_i32, %c0_i32_0 : i32, i32
  }
  func.func @transform_5(%arg0: i32) -> (i32, i32) {
    %c0_i32 = arith.constant 0 : i32
    %c0_i32_0 = arith.constant 0 : i32
    return %arg0, %c0_i32 : i32, i32
  }
}

</mosaic_0001>

<bundles_post_ra>
// kernel: tpu_custom_call.1
= control target key start
LH: loop header
LB: loop body
LE: loop exit
PB: predicated region body
PF: predicated region fallthrough
CT: control target
= control target key end

     0   :  { %s1274_s0 = inlined_call_operand.hbm [shape: f32[50,64], index: 0, kind: input, shape index: {}]   ;;  %s1275_s1 = inlined_call_operand.hbm [shape: f32[64,64], index: 1, kind: input, shape index: {}]   ;;  %s1276_s2 = inlined_call_operand.vmem [shape: f32[1,64], index: 2, kind: input, shape index: {}]   ;;  %s1277_s3 = inlined_call_operand.vmem [shape: f32[1,32], index: 3, kind: input, shape index: {}]   ;;  %s1278_s4 = inlined_call_operand.<no memory space> [shape: f32[1,1], index: 4, kind: input, shape index: {}]   ;;  %s1279_s5 = inlined_call_operand.vmem [shape: f32[50,1], index: 5, kind: output, shape index: {}]  }
   0x1   :  { %v10_v0 = vstv %s1278_s4 }
   0x2   :  { %11 = vst [vmem:[#allocation2] sm:$0x1] %v10_v0 }
   0x3   :  { %12 = vsyncpa [#allocation4], 0 }
   0x4   :  { %14 = vsyncpa [#allocation4 + $0x1], 0 }
   0x5   :  { %15 = vsyncpa [#allocation6], 0  ;;  %s1067_s20 = smov 0   ;;  %s1069_s21 = smov 0  }
   0x6   :  { %s1071_s22 = smov 0   ;;  %s1073_s23 = smov 0  }
   0x7 LB: > { %s1086_s4 = sadd.s32 4294967295, %s993_s23   ;;  %s1089_s24 = sadd.s32 1, %s993_s23   ;;  %s993_s23 = sphi %s1073_s23, %s1294_s23   ;;  %s989_s22 = sphi %s1071_s22, %s1293_s22   ;;  %s985_s21 = sphi %s1069_s21, %s1292_s21   ;;  %s981_s20 = sphi %s1067_s20, %s1291_s20  }
   0x8   : > { %s25_s25 = ssub.s32 %s993_s23, %s1089_s24  ;;  %s28_s26 = sadd.s32 1, %s989_s22 }
   0x9   : > { %p26_p0 = scmp.eq.s32.totalorder %s25_s25, 0  ;;  %p35_p1 = scmp.ne.s32.totalorder %s989_s22, %s985_s21 }
   0xa   : > { %p36_p2 = scmp.eq.s32.totalorder %s993_s23, 0  ;;  %p41_p3 = scmp.ne.s32.totalorder %s985_s21, %s981_s20 }
   0xb   : > { %s1099_s27 = scalar_select %p26_p0, %s989_s22, %s28_s26  }
   0xc   : > { %p1101_p4 = por %p36_p2, %p35_p1  ;;  %p1280_p5 = scmp.eq.s32.totalorder %s1086_s4, 0 }
   0xd   : > { %p149_p6 = scmp.eq.s32.totalorder %s1086_s4, 1  ;;  %p659_p7 = scmp.ge.s32.totalorder %s993_s23, 1 }
   0xe   : > { %p1110_p8 = por %p1280_p5, %p41_p3  ;;  %p162_p9 = scmp.lt.s32.totalorder %s993_s23, 3 }
   0xf   : > { %p1115_p10 = por %p149_p6, %p35_p1  ;;  %s173_s9 = sshll.u32 %s1275_s1, 4  ;;  %s174_s9 = int_to_ptr.hbm [resolvable:$true] %s173_s9 }
  0x10   : > { %p1119_p11 = pnand %p659_p7, %p162_p9  ;;  %s1027_s10 = smov [#allocation5]  }
  0x11   : > { %s175_s11 = sshll.u32 %s1027_s10, 4  ;;  %s1028_s12 = smov 128   ;;  %s176_s11 = int_to_ptr.vmem [resolvable:$true] %s175_s11 }
  0x12   : > { %p727_p12 = pneg %p1119_p11  ;;  %s1029_s13 = smov 8  }
  0x13   : > { %p661_p0 = scmp.ge.s32.totalorder %s993_s23, 2 }
  0x14   : > { %p728_p13 = pnand %p727_p12, %p1280_p5 }
  0x15   : > { %194 = sbr.rel (%p661_p0) target bundleno = 62 (0x3e), region = 32 }
  0x16   : > { %730 = dma.hbm_to_vmem [thread:$0]  (!%p728_p13), %s174_s9, 1024, %s176_s11, [#allocation6], %s1028_s12, %s1028_s12, %s1029_s13  }
  0x1a   : > { %197 = sbr.rel (!%p1101_p4) target bundleno = 62 (0x3e), region = 36  ;;  %s198_s14 = sand.u32 (%p1101_p4), 1, %s989_s22  }
  0x1b   : > { %s663_s15 = sshll.u32 (%p1101_p4), %s993_s23, 2  ;;  %s662_s16 = sshll.u32 (%p1101_p4), %s198_s14, 5 }
  0x1c   : > { %s204_s17 = ssub.s32 (%p1101_p4), 7, %s663_s15  ;;  %s1138_s25 = scalar_lea.sflag (%p1101_p4), [#allocation4], %s198_s14 }
  0x1d   : > { %p205_p1 = scmp.lt.s32.totalorder (%p1101_p4), %s204_s17, 4  ;;  %s202_s26 = scalar_lea.vmem (%p1101_p4), [#allocation3], %s662_s16 }
  0x1f   : > { %s1296_s17 = smov (!%p205_p1, %s204_s17), 4 }
  0x20   : > { %s664_s18 = sshll.u32 %s1296_s17, 3 }
  0x21   : > { %s208_s19 = ssub.s32 32, %s664_s18 }
  0x22   : > { %s209_s20 = sshll.u32 %s208_s19, 4 }
  0x23   : > { %210 = vsyncadd %s1138_s25, %s209_s20  ;;  %p1141_p2 = scmp.ne.s32.totalorder %s664_s18, 0  ;;  %s694_s7 = sshll.u32 %s993_s23, 5 }
  0x24   : > { %s213_s10 = scalar_lea.hbm %s1274_s0, %s694_s7  ;;  %s1149_s11 = sshll.u32 %s202_s26, 4  ;;  %s218_s11 = int_to_ptr.vmem [resolvable:$true] %s1149_s11 }
  0x25   : > { %s215_s12 = sshll.u32 %s213_s10, 4  ;;  %s668_s13 = sshll.u32 %s1296_s17, 7  ;;  %s1152_s12 = int_to_ptr.hbm [resolvable:$true] %s215_s12 }
  0x26   : > { %s884_s14 = sshra.s32 %s1152_s12, 4  ;;  %s886_s15 = sshrl.u32 %s668_s13, 4  ;;  %s885_s14 = int_to_ptr.hbm [resolvable:$true] %s884_s14 }
  0x27   : > { %s891_s16 = scalar_lea.hbm %s885_s14, %s886_s15  ;;  %s895_s19 = scalar_lea.hbm %s1274_s0, 56 }
  0x28   : > { %p892_p3 = scmp.ne.s32.totalorder %s885_s14, %s891_s16  ;;  %p896_p7 = scmp.lt.s32.totalorder %s885_s14, %s1274_s0 }
  0x29   : > { %p897_p9 = scmp.lt.s32.totalorder %s895_s19, %s891_s16 }
  0x2a   : > { %p893_p4 = pnand %p892_p3, %p1141_p2 }
  0x2b   : > { %p898_p12 = por %p897_p9, %p896_p7 }
  0x2c   : > { %p894_p6 = pneg %p893_p4 }
  0x2e   : > { %p899_p13 = pnand %p898_p12, %p894_p6 }
  0x30   : > { %902 = shalt.err (!%p899_p13)
}
  0x31   : > { %s903_s7 = sshra.s32 %s218_s11, 4  ;;  %s1030_s9 = smov [#allocation3]   ;;  %s904_s7 = int_to_ptr.vmem [resolvable:$true] %s903_s7 }
  0x32   : > { %s910_s8 = scalar_lea.vmem %s904_s7, %s886_s15  ;;  %s914_s10 = scalar_lea.vmem %s1030_s9, 64 }
  0x33   : > { %p911_p0 = scmp.ne.s32.totalorder %s904_s7, %s910_s8  ;;  %p916_p4 = scmp.lt.s32.totalorder %s914_s10, %s910_s8 }
  0x35   : > { %p912_p1 = pnand %p911_p0, %p1141_p2 }
  0x37   : > { %p913_p3 = pneg %p912_p1 }
  0x39   : > { %p918_p5 = pnand %p916_p4, %p913_p3 }
  0x3b   : > { %921 = shalt.err (!%p918_p5)
}
  0x3c   : > { %s1031_s14 = smov 128   ;;  %s1032_s16 = smov 8  }
  0x3d   : > { %223 = dma.hbm_to_vmem [thread:$0]  (%p1141_p2), %s1152_s12, %s668_s13, %s218_s11, %s1138_s25, %s1031_s14, %s1031_s14, %s1032_s16  }
  0x3e PF: > { %229 = sbr.rel (%p1119_p11) target bundleno = 520 (0x208), region = 40  ;;  %s231_s15 = sand.u32 (!%p1119_p11), 1, %s985_s21  }
  0x3f   : > { %s1181_s23 = sshll.u32 (!%p1119_p11), %s231_s15, 5  ;;  %s232_s18 = scalar_lea.sflag (!%p1119_p11), [#allocation4], %s231_s15 }
  0x40   : > { %s1184_s19 = scalar_lea.vmem (!%p1119_p11), [#allocation3], %s1181_s23 }
  0x43   : > { %972 = dma.done.wait (%p1110_p8), %s232_s18, 512  }
  0x44   : > { %974 = vsyncadd (%p1110_p8), %s232_s18, 4294966784  ;;  %p1286_p5 = scmp.eq.s32.totalorder %s1086_s4, 0 }
  0x46   : > { %976 = dma.done.wait (%p1286_p5), [#allocation6], 1024   ;;  %p1287_p2 = pmov %p1286_p5 }
  0x47   : > { %v288_v1 = vld [vmem:[#allocation5 + $0x38] sm:$0xff]  ;;  %v287_v2 = vld [vmem:[#allocation5 + $0x30] sm:$0xff]  ;;  %v286_v3 = vld [vmem:[#allocation5 + $0x28] sm:$0xff]  ;;  %vm293_vm0 = vcmask 523264   ;;  %s1033_s17 = smov 96   ;;  %vm383_vm1 = vcmask 261120  }
  0x48   : > { %978 = vsyncadd (%p1287_p2), [#allocation6], 4294966272  ;;  %314 = vmatpush.msra.mxu0 %v288_v1  ;;  %699 = vmatpush.msra.mxu2 %v288_v1  ;;  %v285_v4 = vld [vmem:[#allocation5 + $0x20] sm:$0xff]  ;;  %v284_v5 = vld [vmem:[#allocation5 + $0x18] sm:$0xff]  ;;  %vm404_vm2 = vcmask 7168   ;;  %s1209_s11 = scalar_lea.vmem [#allocation7], %s1181_s23  }
  0x49   : > { %698 = vmatpush.msra.mxu1 %v288_v1  ;;  %700 = vmatpush.msra.mxu3 %v288_v1  ;;  %v283_v6 = vld [vmem:[#allocation5 + $0x10] sm:$0xff]  ;;  %v282_v7 = vld [vmem:[#allocation5 + $0x8] sm:$0xff]  ;;  %v281_v8 = vld [vmem:[#allocation5] sm:$0xff]  ;;  %s678_s12 = sshll.u32 (%p1115_p10), %s1086_s4, 2  ;;  %s695_s13 = sshll.u32 (%p1115_p10), %s1086_s4, 5 }
  0x4a   : > { %315 = vmatpush.msra.mxu0 %v287_v2  ;;  %702 = vmatpush.msra.mxu2 %v287_v2  ;;  %v277_v9 = vld [vmem:[%s1184_s19] sm:$0xff]  ;;  %v279_v10 = vld [vmem:[%s1184_s19 + $0x10] sm:$0xff]  ;;  %v278_v11 = vld [vmem:[%s1184_s19 + $0x8] sm:$0xff]  ;;  %s417_s20 = ssub.s32 (%p1115_p10), 7, %s678_s12  ;;  %s1222_s8 = scalar_lea.vmem (%p1115_p10), %s1279_s5, %s695_s13  }
  0x4b   : > { %701 = vmatpush.msra.mxu1 %v287_v2  ;;  %703 = vmatpush.msra.mxu3 %v287_v2  ;;  %v280_v12 = vld [vmem:[%s1184_s19 + $0x18] sm:$0xff]  ;;  %p418_p8 = scmp.lt.s32.totalorder (%p1115_p10), %s417_s20, 4 }
  0x4c   : > { %316 = vmatpush.msra.mxu0 %v286_v3  ;;  %705 = vmatpush.msra.mxu2 %v286_v3  ;;  %v835_v13 = vld [vmem:[%s1276_s2] ss:$0 sm:$0xff] }
  0x4d   : > { %704 = vmatpush.msra.mxu1 %v286_v3  ;;  %706 = vmatpush.msra.mxu3 %v286_v3  ;;  %v836_v38 = vld [vmem:[%s1277_s3] ss:$0 sm:$0xff] }
  0x4e   : > { %317 = vmatpush.msra.mxu0 %v285_v4  ;;  %708 = vmatpush.msra.mxu2 %v285_v4  ;;  %v837_v59 = vld [vmem:[#allocation2] ss:$0 sm:$0xff] }
  0x4f   : > { %707 = vmatpush.msra.mxu1 %v285_v4  ;;  %709 = vmatpush.msra.mxu3 %v285_v4 }
  0x50   : > { %318 = vmatpush.msra.mxu0 %v284_v5  ;;  %711 = vmatpush.msra.mxu2 %v284_v5 }
  0x51   : > { %710 = vmatpush.msra.mxu1 %v284_v5  ;;  %712 = vmatpush.msra.mxu3 %v284_v5 }
  0x52   : > { %319 = vmatpush.msra.mxu0 %v283_v6  ;;  %714 = vmatpush.msra.mxu2 %v283_v6 }
  0x53   : > { %713 = vmatpush.msra.mxu1 %v283_v6  ;;  %715 = vmatpush.msra.mxu3 %v283_v6 }
  0x54   : > { %320 = vmatpush.msra.mxu0 %v282_v7  ;;  %717 = vmatpush.msra.mxu2 %v282_v7 }
  0x55   : > { %716 = vmatpush.msra.mxu1 %v282_v7  ;;  %718 = vmatpush.msra.mxu3 %v282_v7 }
  0x56   : > { %321 = vmatpush.msra.mxu0 %v281_v8  ;;  %720 = vmatpush.msra.mxu2 %v281_v8 }
  0x57   : > { %673 = vmatmul.msk.f32.vlgmr.msra.gmra.mxu0 %vm293_vm0, %v277_v9  ;;  %675 = vmatmul.msk.f32.vlgmr.msra.gmra.mxu2 %vm293_vm0, %v279_v10 }
  0x58   : > { %719 = vmatpush.msra.mxu1 %v281_v8  ;;  %721 = vmatpush.msra.mxu3 %v281_v8 }
  0x59   : > { %674 = vmatmul.msk.f32.vlgmr.msra.gmra.mxu1 %vm293_vm0, %v278_v11  ;;  %676 = vmatmul.msk.f32.vlgmr.msra.gmra.mxu3 %vm293_vm0, %v280_v12 }
  0xd4   : > { %v323_v14 = vpop.f32.mrf.mxu0 }
  0xd5   : > { %v324_v15 = vadd.f32 %v835_v13, %v323_v14 }
  0xd6   : > { %v326_v16 = vpop.f32.mrf.mxu1 }
  0xd7   : > { %v339_v17 = vmul.f32 0.5, %v324_v15  ;;  %v327_v18 = vadd.f32 %v835_v13, %v326_v16 }
  0xd9   : > { %838 = vtanh.f32 %v339_v17  ;;  %v340_v19 = vmul.f32 0.5, %v327_v18 }
  0xda   : > { %v329_v20 = vpop.f32.mrf.mxu2 }
  0xdb   : > { %v330_v21 = vadd.f32 %v835_v13, %v329_v20  ;;  %840 = vtanh.f32 %v340_v19 }
  0xdc   : > { %v332_v22 = vpop.f32.mrf.mxu3 }
  0xdd   : > { %v341_v23 = vmul.f32 0.5, %v330_v21  ;;  %v333_v24 = vadd.f32 %v835_v13, %v332_v22 }
  0xdf   : > { %v839_v25 = vpop.eup %838  ;;  %842 = vtanh.f32 %v341_v23  ;;  %v342_v26 = vmul.f32 0.5, %v333_v24 }
  0xe0   : > { %v347_v27 = vadd.f32 1.0, %v839_v25 }
  0xe1   : > { %v841_v28 = vpop.eup %840  ;;  %844 = vtanh.f32 %v342_v26 }
  0xe2   : > { %v351_v29 = vmul.f32 0.5, %v347_v27  ;;  %v348_v30 = vadd.f32 1.0, %v841_v28  ;;  %846 = vtanh.f32 %v324_v15 }
  0xe3   : > { %848 = vtanh.f32 %v330_v21 }
  0xe4   : > { %359 = vrot.lane.b32.xlu0 %v351_v29, %s1033_s17  ;;  %v352_v35 = vmul.f32 0.5, %v348_v30  ;;  %850 = vtanh.f32 %v327_v18 }
  0xe5   : > { %v843_v31 = vpop.eup %842  ;;  %852 = vtanh.f32 %v333_v24 }
  0xe6   : > { %v349_v32 = vadd.f32 1.0, %v843_v31 }
  0xe7   : > { %v845_v33 = vpop.eup %844 }
  0xe8   : > { %v353_v34 = vmul.f32 0.5, %v349_v32  ;;  %v350_v36 = vadd.f32 1.0, %v845_v33  ;;  %v847_v39 = vpop.eup %846 }
  0xe9   : > { %v849_v44 = vpop.eup %848 }
  0xea   : > { %363 = vrot.lane.b32.xlu1 %v353_v34, %s1033_s17  ;;  %v354_v37 = vmul.f32 0.5, %v350_v36  ;;  %v851_v47 = vpop.eup %850 }
  0xeb   : > { %v853_v54 = vpop.eup %852 }
  0xec   : > { %361 = vrot.lane.b32.xlu0 %v352_v35, %s1033_s17 }
  0xf2   : > { %365 = vrot.lane.b32.xlu1 %v354_v37, %s1033_s17 }
 0x156   : > { %v360_v40 = vpop.permute.xlu0 %359 }
 0x157   : > { %v371_v41 = vmul.f32 %v847_v39, %v360_v40 }
 0x159   : > { %v379_v42 = vmul.f32 %v836_v38, %v371_v41 }
 0x15b   : > { %v384_v43 = vsel %vm383_vm1, %v379_v42, 0.0 }
 0x15c   : > { %v364_v45 = vpop.permute.xlu1 %363  ;;  %385 = vadd.xlane.f32.xlu2 %v384_v43 }
 0x15d   : > { %v373_v46 = vmul.f32 %v849_v44, %v364_v45 }
 0x15e   : > { %v362_v48 = vpop.permute.xlu0 %361 }
 0x15f   : > { %v372_v49 = vmul.f32 %v851_v47, %v362_v48  ;;  %v381_v50 = vmul.f32 %v836_v38, %v373_v46 }
 0x161   : > { %v390_v51 = vsel %vm383_vm1, %v381_v50, 0.0  ;;  %v380_v52 = vmul.f32 %v836_v38, %v372_v49 }
 0x162   : > { %391 = vadd.xlane.f32.xlu0 %v390_v51 }
 0x163   : > { %v387_v53 = vsel %vm383_vm1, %v380_v52, 0.0 }
 0x164   : > { %v366_v55 = vpop.permute.xlu1 %365  ;;  %388 = vadd.xlane.f32.xlu2 %v387_v53 }
 0x165   : > { %v374_v56 = vmul.f32 %v853_v54, %v366_v55 }
 0x167   : > { %v382_v57 = vmul.f32 %v836_v38, %v374_v56 }
 0x169   : > { %v393_v58 = vsel %vm383_vm1, %v382_v57, 0.0 }
 0x16a   : > { %394 = vadd.xlane.f32.xlu1 %v393_v58 }
 0x1cf   : > { %v386_v60 = vpop.xlane.xlu2 %385 }
 0x1d0   : > { %v400_v61 = vadd.f32 %v837_v59, %v386_v60 }
 0x1d2   : > { %405 = vst.msk [vmem:[%s1209_s11] sm:$0xff] %vm404_vm2, %v400_v61 }
 0x1d5   : > { %v392_v62 = vpop.xlane.xlu0 %391 }
 0x1d6   : > { %v402_v63 = vadd.f32 %v837_v59, %v392_v62 }
 0x1d7   : > { %v389_v0 = vpop.xlane.xlu2 %388 }
 0x1d8   : > { %407 = vst.msk [vmem:[%s1209_s11 + $0x10] sm:$0xff] %vm404_vm2, %v402_v63  ;;  %v401_v1 = vadd.f32 %v837_v59, %v389_v0 }
 0x1da   : > { %406 = vst.msk [vmem:[%s1209_s11 + $0x8] sm:$0xff] %vm404_vm2, %v401_v1 }
 0x1dc   : > { %415 = sbr.rel (!%p1115_p10) target bundleno = 520 (0x208), region = 52 }
 0x1dd   : > { %v395_v2 = vpop.xlane.xlu1 %394 }
 0x1de   : > { %v403_v3 = vadd.f32 %v837_v59, %v395_v2 }
 0x1e0   : > { %408 = vst.msk [vmem:[%s1209_s11 + $0x18] sm:$0xff] %vm404_vm2, %v403_v3 }
 0x1e1   : > { %s1298_s20 = smov (!%p418_p8, %s417_s20), 4 }
 0x1e2   : > { %s679_s9 = sshll.u32 %s1298_s20, 3 }
 0x1e3   : > { %p682_p11 = scmp.eq.s32.totalorder %s679_s9, 0 }
 0x1e4   : > { %s1228_s30 = sshrl.u32 (!%p682_p11), %s1298_s20, 2 }
 0x1e5   : > { %426 = sbr.rel (%p682_p11) target bundleno = 520 (0x208), region = 56  ;;  %p683_p10 = scmp.le.s32.totalorder (!%p682_p11), %s1228_s30, 0 }
 0x1ea   : > { %602 = sbr.rel (%p683_p10) target bundleno = 503 (0x1f7), region = 138  ;;  %s1288_s4 = smov (!%p683_p10), %s1222_s8 }
 0x1eb   : > { %s1289_s10 = smov (!%p683_p10), %s1209_s11  ;;  %s1237_s14 = smov (!%p683_p10), 0  }
 0x1ec   : > { %s1007_s16 = smov (!%p683_p10), 0  }
 0x1ef LB: >> { %v495_v4 = vld [vmem:[%s1001_s10] sm:$0xff]  ;;  %v497_v5 = vld [vmem:[%s1001_s10 + $0x8] sm:$0xff]  ;;  %v499_v6 = vld [vmem:[%s1001_s10 + $0x10] sm:$0xff]  ;;  %s503_s15 = sadd.s32 1, %s1005_s14  ;;  %s489_s16 = sadd.s32 1, %s1009_s16   ;;  %s1009_s16 = sphi %s1007_s16, %s489_s16   ;;  %s1005_s14 = sphi %s1237_s14, %s1290_s14   ;;  %s1001_s10 = sphi %s1289_s10, %s508_s10   ;;  %s997_s4 = sphi %s1288_s4, %s509_s4  }
 0x1f0   : >> { %496 = vst [vmem:[%s997_s4] sm:$0xff] %v495_v4  ;;  %v501_v7 = vld [vmem:[%s1001_s10 + $0x18] sm:$0xff]  ;;  %p504_p6 = scmp.ge.s32.totalorder %s503_s15, %s1228_s30  ;;  %p488_p7 = scmp.ge.s32.totalorder %s489_s16, %s1228_s30 }
 0x1f1   : >> { %498 = vst [vmem:[%s997_s4 + $0x8] sm:$0xff] %v497_v5 }
 0x1f2   : >> { %500 = vst [vmem:[%s997_s4 + $0x10] sm:$0xff] %v499_v6  ;;  %s1300_s15 = smov (%p504_p6, %s503_s15), 0  ;;  %491 = sbr.rel (!%p488_p7) target bundleno = 495 (0x1ef), region = 144 }
 0x1f3   : >> { %502 = vst [vmem:[%s997_s4 + $0x18] sm:$0xff] %v501_v7  ;;  %s684_s23 = sshll.u32 %s1300_s15, 5  ;;  %s1290_s14 = smov %s1300_s15 }
 0x1f4   : >> { %s508_s10 = scalar_lea.vmem %s1209_s11, %s684_s23 [#allocation7]   ;;  %s509_s4 = scalar_lea.vmem %s1222_s8, %s684_s23  }
 0x1f7 PF: > { %s1253_s18 = sand.u32 3, %s1298_s20   ;;  %s696_s19 = sshll.u32 %s1228_s30, 5 }
 0x1f8   : > { %s514_s29 = scalar_lea.vmem %s1209_s11, %s696_s19 [#allocation7]   ;;  %s516_s6 = scalar_lea.vmem %s1222_s8, %s696_s19  }
 0x1f9   : > { %p689_p9 = scmp.le.s32.totalorder %s1253_s18, 0 }
 0x1fa   : > { %s1011_s17 = smov (!%p689_p9), %s516_s6   ;;  %s1015_s25 = smov (!%p689_p9), %s514_s29  }
 0x1fb   : > { %616 = sbr.rel (%p689_p9) target bundleno = 520 (0x208), region = 149  ;;  %s1019_s28 = smov (!%p689_p9), 0  }
 0x1fc   : > { %s1023_s12 = smov (!%p689_p9), 0  }
 0x200 LB: >> { %v526_v8 = vld [vmem:[%s1017_s25] sm:$0xff]  ;;  %s528_s13 = sadd.s32 1, %s1021_s28  ;;  %s520_s12 = sadd.s32 1, %s1025_s12   ;;  %s1025_s12 = sphi %s1023_s12, %s520_s12   ;;  %s1021_s28 = sphi %s1019_s28, %s1020_s28   ;;  %s1017_s25 = sphi %s1015_s25, %s533_s25   ;;  %s1013_s17 = sphi %s1011_s17, %s534_s17  }
 0x201   : >> { %527 = vst [vmem:[%s1013_s17] sm:$0xff] %v526_v8  ;;  %p529_p12 = scmp.ge.s32.totalorder %s528_s13, %s1253_s18  ;;  %p519_p13 = scmp.ge.s32.totalorder %s520_s12, %s1253_s18 }
 0x203   : >> { %s1302_s13 = smov (%p529_p12, %s528_s13), 0  ;;  %522 = sbr.rel (!%p519_p13) target bundleno = 512 (0x200), region = 155 }
 0x204   : >> { %s690_s11 = sshll.u32 %s1302_s13, 3  ;;  %s1020_s28 = smov %s1302_s13  }
 0x205   : >> { %s533_s25 = scalar_lea.vmem %s514_s29, %s690_s11 [#allocation7]   ;;  %s534_s17 = scalar_lea.vmem %s516_s6, %s690_s11  }
 0x208 PF: > { %p18_p0 = scmp.ge.s32.totalorder %s1089_s24, 4   ;;  %s1291_s20 = smov %s985_s21 }
 0x209   : > { %s1292_s21 = smov %s989_s22  ;;  %s1293_s22 = smov %s1099_s27 }
 0x20a   : > { %s1294_s23 = smov %s1089_s24  ;;  %20 = sbr.rel (!%p18_p0) target bundleno = 7 (0x7), region = 166 }
 0x20f   :  { %550 = vsyncpa [#allocation4], 1 }
 0x210   :  { %552 = vsyncpa [#allocation4 + $0x1], 1 }
 0x211   :  { %553 = vsyncpa [#allocation6], 1 }

</bundles_post_ra>
